<compile_context>
chip_gen: v6e
topology: v6e:2x2x1
jax: 0.10.0
libtpu: 0.0.40
codegen_flags: <defaults>
</compile_context>

<pallas_src>
import math

import jax
import jax.numpy as jnp
from jax.experimental import pallas as pl
from jax.experimental.pallas import tpu as pltpu


def _pos_embedding(emb_size: int, maxlen: int) -> jnp.ndarray:
    """Deterministic sinusoidal positional table, shape (maxlen, emb_size)."""
    den = jnp.exp(-jnp.arange(0, emb_size, 2, dtype=jnp.float32)
                  * (math.log(10000.0) / emb_size))            # (ceil(E/2),)
    pos = jnp.arange(0, maxlen, dtype=jnp.float32)[:, None]     # (maxlen, 1)
    sin = jnp.sin(pos * den)
    cos = jnp.cos(pos * den)
    pe = jnp.zeros((maxlen, emb_size), dtype=jnp.float32)
    pe = pe.at[:, 0::2].set(sin)
    pe = pe.at[:, 1::2].set(cos[:, : emb_size // 2])   # safe for odd emb_size
    return pe


def _pe_kernel(tok_ref, pos_ref, out_ref):
    # tok_ref: (TS, B)   int32   token ids for this seq tile
    # pos_ref: (TS, E)   f32     positional rows for this seq tile
    # out_ref: (TS, B*E) f32     lane-dense flattened output slab
    ts, b = tok_ref.shape
    e = pos_ref.shape[-1]

    tok = tok_ref[...]                                     # (TS, B)
    pos = pos_ref[...]                                     # (TS, E)
    pos_plus_one = pos + 1.0                               # hoisted once / tile

    col = jax.lax.broadcasted_iota(jnp.int32, (ts, e), 1)  # embedding index

    # Broadcast the positional rows over batch in VMEM: one fused select per
    # batch column, stored to a static lane slice of the output slab
    # (ref slices are zero-cost views; no in-VMEM concatenate needed).
    for bi in range(b):
        hit = col == tok[:, bi:bi + 1]                     # (TS, E) bool
        out_ref[:, bi * e:(bi + 1) * e] = jnp.where(hit, pos_plus_one, pos)


def _pick_seq_tile(S: int, B: int, E: int,
                   target_bytes: int = 2 * 1024 * 1024) -> int:
    """Largest seq tile (divisor of S, sublane-aligned) within ~target_bytes
    of f32 output per grid step, preferring >=2 grid steps (v7x megacore)."""
    bytes_per_seq_row = B * E * 4
    max_rows = max(1, target_bytes // bytes_per_seq_row)
    divs = [d for d in range(1, S + 1) if S % d == 0]
    ok = [d for d in divs if d <= max_rows and (d % 8 == 0 or d == S)]
    if not ok:
        # TODO(synk): pad / masked last tile for awkward S; fall back to a
        # single full-extent block (always BlockSpec-legal) for now.
        return S
    multi = [d for d in ok if d < S]
    return max(multi) if multi else max(ok)


def positional_encoding(token: jnp.ndarray,
                        emb_size: int,
                        maxlen: int = 500) -> jnp.ndarray:
    """token: (S, B) int -> (S, B, E) float32."""
    S, B = token.shape
    token = token.astype(jnp.int32)
    pe = _pos_embedding(emb_size, maxlen)[:S]               # (S, E), glue in JAX
    seq_tile = _pick_seq_tile(S, B, emb_size)
    grid = (S // seq_tile,)

    out2d = pl.pallas_call(
        _pe_kernel,
        out_shape=jax.ShapeDtypeStruct((S, B * emb_size), jnp.float32),
        grid_spec=pltpu.PrefetchScalarGridSpec(
            num_scalar_prefetch=0,
            grid=grid,
            in_specs=[
                pl.BlockSpec((seq_tile, B), lambda i: (i, 0)),
                pl.BlockSpec((seq_tile, emb_size), lambda i: (i, 0)),
            ],
            out_specs=pl.BlockSpec((seq_tile, B * emb_size),
                                   lambda i: (i, 0)),
        ),
        compiler_params=pltpu.CompilerParams(
            dimension_semantics=("parallel",),
            vmem_limit_bytes=48 * 1024 * 1024),
    )(token, pe)

    # Free reshape: row-major (S, B*E) is layout-identical to (S, B, E).
    return out2d.reshape(S, B, emb_size)


def positional_encoding_ref(token: jnp.ndarray, emb_size: int,
                            maxlen: int = 500) -> jnp.ndarray:
    pe = _pos_embedding(emb_size, maxlen)
    one_hot = jax.nn.one_hot(token, emb_size, dtype=jnp.float32)  # (S, B, E)
    return one_hot + pe[: token.shape[0]][:, None, :]


if __name__ == "__main__":
    key = jax.random.PRNGKey(0)
    S, B, E = 64, 2, 32
    token = jax.random.randint(key, (S, B), 0, E, dtype=jnp.int32)

    out = positional_encoding(token, emb_size=E)
    out = jax.block_until_ready(out)

    ref = positional_encoding_ref(token, emb_size=E)
    assert out.shape == (S, B, E)
    assert jnp.allclose(out, ref, atol=1e-6), "mismatch vs reference"
    print("KERNEL_OK")
</pallas_src>

<mosaic_0001>
module attributes {stable_mosaic.version = 11 : i64} {
  func.func @_pe_kernel(%arg0: i32, %arg1: memref<32x2xi32, #tpu.memory_space<vmem>>, %arg2: memref<32x32xf32, #tpu.memory_space<vmem>>, %arg3: memref<32x64xf32, #tpu.memory_space<vmem>>) attributes {dimension_semantics = [#tpu.dimension_semantics<parallel>], iteration_bounds = array<i64: 2>, scalar_prefetch = 0 : i64, scratch_operands = 0 : i64, tpu.core_type = #tpu.core_type<tc>, window_params = [{transform_indices = @transform_0, window_bounds = array<i64: 32, 2>}, {transform_indices = @transform_1, window_bounds = array<i64: 32, 32>}, {transform_indices = @transform_2, window_bounds = array<i64: 32, 64>}]} {
    %c0 = arith.constant 0 : index
    %c0_0 = arith.constant 0 : index
    %0 = vector.load %arg1[%c0, %c0_0] : memref<32x2xi32, #tpu.memory_space<vmem>>, vector<32x2xi32>
    %c0_1 = arith.constant 0 : index
    %c0_2 = arith.constant 0 : index
    %1 = vector.load %arg2[%c0_1, %c0_2] : memref<32x32xf32, #tpu.memory_space<vmem>>, vector<32x32xf32>
    %cst = arith.constant 1.000000e+00 : f32
    %2 = vector.broadcast %cst : f32 to vector<32x32xf32>
    %3 = arith.addf %1, %2 : vector<32x32xf32>
    %4 = tpu.iota {dimensions = array<i32: 1>} : vector<32x32xi32>
    %5 = vector.extract_strided_slice %0 {offsets = [0, 0], sizes = [32, 1], strides = [1, 1]} : vector<32x2xi32> to vector<32x1xi32>
    %6 = vector.broadcast %5 : vector<32x1xi32> to vector<32x32xi32>
    %7 = arith.cmpi eq, %4, %6 : vector<32x32xi32>
    %8 = arith.select %7, %3, %1 : vector<32x32xi1>, vector<32x32xf32>
    %c0_3 = arith.constant 0 : index
    %c0_4 = arith.constant 0 : index
    %9 = vector.load %arg3[%c0_3, %c0_4] : memref<32x64xf32, #tpu.memory_space<vmem>>, vector<32x32xf32>
    tpu.vector_store %arg3[%c0_3, %c0_4], %8 {strides = array<i32>} : memref<32x64xf32, #tpu.memory_space<vmem>>, vector<32x32xf32>,
    %10 = vector.extract_strided_slice %0 {offsets = [0, 1], sizes = [32, 1], strides = [1, 1]} : vector<32x2xi32> to vector<32x1xi32>
    %11 = vector.broadcast %10 : vector<32x1xi32> to vector<32x32xi32>
    %12 = arith.cmpi eq, %4, %11 : vector<32x32xi32>
    %13 = arith.select %12, %3, %1 : vector<32x32xi1>, vector<32x32xf32>
    %c0_5 = arith.constant 0 : index
    %c32 = arith.constant 32 : index
    %14 = vector.load %arg3[%c0_5, %c32] : memref<32x64xf32, #tpu.memory_space<vmem>>, vector<32x32xf32>
    tpu.vector_store %arg3[%c0_5, %c32], %13 {strides = array<i32>} : memref<32x64xf32, #tpu.memory_space<vmem>>, vector<32x32xf32>,
    return
  }
  func.func @transform_0(%arg0: i32) -> (i32, i32) {
    %c0_i32 = arith.constant 0 : i32
    %c0_i32_0 = arith.constant 0 : i32
    return %arg0, %c0_i32 : i32, i32
  }
  func.func @transform_1(%arg0: i32) -> (i32, i32) {
    %c0_i32 = arith.constant 0 : i32
    %c0_i32_0 = arith.constant 0 : i32
    return %arg0, %c0_i32 : i32, i32
  }
  func.func @transform_2(%arg0: i32) -> (i32, i32) {
    %c0_i32 = arith.constant 0 : i32
    %c0_i32_0 = arith.constant 0 : i32
    return %arg0, %c0_i32 : i32, i32
  }
}

</mosaic_0001>

<bundles_post_ra>
// kernel: tpu_custom_call.1
= control target key start
LH: loop header
LB: loop body
LE: loop exit
PB: predicated region body
PF: predicated region fallthrough
CT: control target
= control target key end

     0   :  { %7 = vsyncpa [#allocation3], 0  ;;  %s594_s0 = inlined_call_operand.vmem [shape: s32[64,2], index: 0, kind: input, shape index: {}]   ;;  %s595_s1 = inlined_call_operand.vmem [shape: f32[64,32], index: 1, kind: input, shape index: {}]   ;;  %s596_s2 = inlined_call_operand.hbm [shape: f32[64,64], index: 2, kind: output, shape index: {}]  }
   0x1   :  { %9 = vsyncpa [#allocation3 + $0x1], 0  ;;  %s482_s9 = smov 0   ;;  %s484_s10 = smov 0  }
   0x2   :  { %s486_s11 = smov 0   ;;  %s488_s12 = smov 0  }
   0x3 LB: > { %s503_s13 = sadd.s32 4294967295, %s459_s12   ;;  %s335_s14 = sadd.s32 4294967294, %s459_s12   ;;  %s459_s12 = sphi %s488_s12, %s602_s12   ;;  %s455_s11 = sphi %s486_s11, %s601_s11   ;;  %s451_s10 = sphi %s484_s10, %s600_s10   ;;  %s447_s9 = sphi %s482_s9, %s599_s9  }
   0x4   : > { %s507_s15 = sadd.s32 1, %s459_s12   ;;  %s74_s16 = sadd.s32 1, %s455_s11 }
   0x5   : > { %s71_s17 = ssub.s32 %s459_s12, %s507_s15  ;;  %p84_p0 = scmp.ne.s32.totalorder %s455_s11, %s451_s10 }
   0x6   : > { %p72_p1 = scmp.eq.s32.totalorder %s71_s17, 0  ;;  %p85_p2 = scmp.eq.s32.totalorder %s503_s13, 1 }
   0x7   : > { %p90_p3 = scmp.ne.s32.totalorder %s451_s10, %s447_s9  ;;  %p91_p4 = scmp.eq.s32.totalorder %s335_s14, 1 }
   0x8   : > { %s518_s18 = scalar_select %p72_p1, %s455_s11, %s74_s16  }
   0x9   : > { %p520_p5 = por %p85_p2, %p84_p0  ;;  %p524_p6 = por %p91_p4, %p90_p3 }
   0xa   : > { %p338_p7 = scmp.ge.s32.totalorder %s459_s12, 1  ;;  %p127_p8 = scmp.lt.s32.totalorder %s459_s12, 3 }
   0xc   : > { %p128_p9 = pnand %p338_p7, %p127_p8 }
   0xd   : > { %s340_s21 = sshll.u32 (!%p128_p9), %s503_s13, 2  ;;  %s463_s29 = smov (!%p128_p9), 32  }
   0xe   : > { %131 = sbr.rel (%p128_p9) target bundleno = 286 (0x11e), region = 28  ;;  %p155_p10 = scmp.lt.s32.totalorder (!%p128_p9), %s340_s21, 7 }
   0xf   : > { %s151_s30 = sand.u32 (!%p128_p9), 1, %s451_s10   ;;  %s349_s5 = sshll.u32 (!%p128_p9), %s503_s13, 9 }
  0x10   : > { %s339_s3 = sshll.u32 (!%p128_p9), %s151_s30, 5  ;;  %s548_s14 = scalar_lea.hbm (!%p128_p9), %s596_s2, %s349_s5 }
  0x11   : > { %s153_s4 = scalar_lea.vmem (!%p128_p9), [#allocation2], %s339_s3  ;;  %s554_s16 = scalar_lea.sflag (!%p128_p9), [#allocation3], %s151_s30 }
  0x12   : > { %s261_s6 = sshll.u32 (!%p128_p9), %s153_s4, 4  ;;  %s464_s17 = smov (!%p128_p9), [#allocation2]   ;;  %s550_s6 = int_to_ptr.vmem [resolvable:$true] %s261_s6 }
  0x13   : > { %v461_v0 = vmov 1   ;;  %s604_s21 = smov (!%p155_p10, %s340_s21), 7  ;;  %v462_v5 = vmov 0   ;;  %v179_v6 = vlaneseq  ;;  %vm201_vm4 = vcmask 261120   ;;  %s399_s13 = scalar_lea.vmem %s550_s6, 512 }
  0x14   : > { %395 = vset.pattern.permute.xlu1 %v461_v0  ;;  %394 = vset.pattern.permute.xlu0 %v461_v0  ;;  %s341_s22 = sshll.u32 %s604_s21, 3  ;;  %vm242_vm9 = vcmask 523520   ;;  %p400_p11 = scmp.ne.s32.totalorder %s550_s6, %s399_s13 }
  0x15   : > { %s158_s25 = scalar_lea.vmem %s594_s0, %s341_s22  ;;  %s164_s28 = scalar_lea.vmem %s595_s1, %s341_s22  ;;  %v180_v8 = vand.u32 127, %v179_v6 }
  0x16   : > { %v169_v1 = vld [vmem:[%s158_s25 + $0x10] sm:$0xff]  ;;  %v167_v2 = vld [vmem:[%s158_s25] sm:$0xff]  ;;  %v170_v3 = vld [vmem:[%s158_s25 + $0x18] sm:$0xff]  ;;  %p401_p12 = pnand %p400_p11, %p520_p5  ;;  %s403_s21 = sshll.u32 %s464_s17, 4  ;;  %s404_s21 = int_to_ptr.vmem [resolvable:$false] %s403_s21 }
  0x17   : > { %213 = vperm.xlu1 %395, %v169_v1   ;;  %207 = vperm.xlu0 %394, %v167_v2   ;;  %v168_v4 = vld [vmem:[%s158_s25 + $0x8] sm:$0xff]  ;;  %v171_v7 = vld [vmem:[%s164_s28] sm:$0xff]  ;;  %v173_v9 = vld [vmem:[%s164_s28 + $0x10] sm:$0xff]  ;;  %s405_s22 = scalar_lea.vmem %s404_s21, 1024  ;;  %p406_p0 = scmp.lt.s32.totalorder %s550_s6, %s404_s21 }
  0x18   : > { %v175_v10 = vadd.f32 1.0, %v171_v7  ;;  %v172_v11 = vld [vmem:[%s164_s28 + $0x8] sm:$0xff]  ;;  %v177_v14 = vadd.f32 1.0, %v173_v9  ;;  %v174_v17 = vld [vmem:[%s164_s28 + $0x18] sm:$0xff]  ;;  %p402_p13 = pneg %p401_p12  ;;  %p407_p1 = scmp.lt.s32.totalorder %s405_s22, %s399_s13 }
  0x19   : > { %v176_v16 = vadd.f32 1.0, %v172_v11  ;;  %v178_v22 = vadd.f32 1.0, %v174_v17 }
  0x1a   : > { %p408_p2 = por %p407_p1, %p406_p0 }
  0x1b   : > { %216 = vperm.xlu1 %395, %v170_v3   ;;  %210 = vperm.xlu0 %394, %v168_v4  }
  0x1c   : > { %p409_p3 = pnand %p408_p2, %p402_p13 }
  0x1f   : > { %397 = vset.pattern.permute.xlu1 %v462_v5  ;;  %396 = vset.pattern.permute.xlu0 %v462_v5 }
  0x20   : > { %185 = vperm.xlu1 %397, %v168_v4   ;;  %182 = vperm.xlu0 %396, %v167_v2  }
  0x24   : > { %188 = vperm.xlu1 %397, %v169_v1   ;;  %191 = vperm.xlu0 %396, %v170_v3  }
  0x28   : > { %398 = vset.pattern.permute.xlu0 %v461_v0 }
  0x92   : > { %v214_v12 = vpop.permute.xlu1 %213  ;;  %v208_v13 = vpop.permute.xlu0 %207 }
  0x93   : > { %vm220_vm0 = vcmp.eq.s32.totalorder %v180_v8, %v214_v12  ;;  %vm218_vm1 = vcmp.eq.s32.totalorder %v180_v8, %v208_v13 }
  0x94   : > { %v222_v15 = vsel %vm218_vm1, %v175_v10, %v171_v7  ;;  %v224_v20 = vsel %vm220_vm0, %v177_v14, %v173_v9 }
  0x95   : > { %230 = vrot.lane.b32.xlu1 %v222_v15, %s463_s29 }
  0x96   : > { %v217_v18 = vpop.permute.xlu1 %216  ;;  %v211_v19 = vpop.permute.xlu0 %210 }
  0x97   : > { %vm219_vm2 = vcmp.eq.s32.totalorder %v180_v8, %v211_v19  ;;  %vm221_vm3 = vcmp.eq.s32.totalorder %v180_v8, %v217_v18 }
  0x98   : > { %v223_v21 = vsel %vm219_vm2, %v176_v16, %v172_v11  ;;  %v225_v25 = vsel %vm221_vm3, %v178_v22, %v174_v17 }
  0x99   : > { %234 = vrot.lane.b32.xlu1 %v224_v20, %s463_s29  ;;  %232 = vrot.lane.b32.xlu0 %v223_v21, %s463_s29 }
  0x9b   : > { %v186_v23 = vpop.permute.xlu1 %185  ;;  %v183_v24 = vpop.permute.xlu0 %182 }
  0x9c   : > { %vm194_vm5 = vcmp.eq.s32.totalorder %v180_v8, %v186_v23  ;;  %vm193_vm6 = vcmp.eq.s32.totalorder %v180_v8, %v183_v24 }
  0x9d   : > { %236 = vrot.lane.b32.xlu0 %v225_v25, %s463_s29  ;;  %v198_v26 = vsel %vm194_vm5, %v176_v16, %v172_v11  ;;  %v197_v27 = vsel %vm193_vm6, %v175_v10, %v171_v7 }
  0x9e   : > { %203 = vst.msk [vmem:[%s153_s4 + $0x8] sm:$0xff] %vm201_vm4, %v198_v26  ;;  %202 = vst.msk [vmem:[%s153_s4] sm:$0xff] %vm201_vm4, %v197_v27 }
  0x9f   : > { %v189_v28 = vpop.permute.xlu1 %188  ;;  %v192_v29 = vpop.permute.xlu0 %191 }
  0xa0   : > { %vm195_vm7 = vcmp.eq.s32.totalorder %v180_v8, %v189_v28  ;;  %vm196_vm8 = vcmp.eq.s32.totalorder %v180_v8, %v192_v29 }
  0xa1   : > { %v199_v30 = vsel %vm195_vm7, %v177_v14, %v173_v9  ;;  %v200_v31 = vsel %vm196_vm8, %v178_v22, %v174_v17 }
  0xa2   : > { %204 = vst.msk [vmem:[%s153_s4 + $0x10] sm:$0xff] %vm201_vm4, %v199_v30  ;;  %205 = vst.msk [vmem:[%s153_s4 + $0x18] sm:$0xff] %vm201_vm4, %v200_v31 }
 0x107   : > { %v231_v32 = vpop.permute.xlu1 %230 }
 0x108   : > { %243 = vst.msk [vmem:[%s153_s4] sm:$0xff] %vm242_vm9, %v231_v32 }
 0x10b   : > { %v235_v33 = vpop.permute.xlu1 %234  ;;  %v233_v34 = vpop.permute.xlu0 %232 }
 0x10c   : > { %245 = vst.msk [vmem:[%s153_s4 + $0x10] sm:$0xff] %vm242_vm9, %v235_v33  ;;  %244 = vst.msk [vmem:[%s153_s4 + $0x8] sm:$0xff] %vm242_vm9, %v233_v34 }
 0x10f   : > { %v237_v35 = vpop.permute.xlu0 %236 }
 0x110   : > { %246 = vst.msk [vmem:[%s153_s4 + $0x18] sm:$0xff] %vm242_vm9, %v237_v35 }
 0x111   : > { %412 = shalt.err (!%p409_p3)
}
 0x112   : > { %s413_s23 = scalar_lea.hbm %s548_s14, 512  ;;  %s417_s26 = scalar_lea.hbm %s596_s2, 1024 }
 0x113   : > { %p414_p4 = scmp.ne.s32.totalorder %s548_s14, %s413_s23  ;;  %p418_p9 = scmp.lt.s32.totalorder %s548_s14, %s596_s2 }
 0x114   : > { %p419_p10 = scmp.lt.s32.totalorder %s417_s26, %s413_s23 }
 0x115   : > { %p415_p7 = pnand %p414_p4, %p520_p5 }
 0x116   : > { %p420_p11 = por %p419_p10, %p418_p9 }
 0x117   : > { %p416_p8 = pneg %p415_p7 }
 0x119   : > { %p421_p12 = pnand %p420_p11, %p416_p8 }
 0x11b   : > { %424 = shalt.err (!%p421_p12)
}
 0x11c   : > { %s465_s29 = smov 128   ;;  %s466_s30 = smov 8  }
 0x11d   : > { %350 = dma.vmem_to_hbm [thread:$0]  (%p520_p5), %s550_s6, 512, %s548_s14, %s554_s16, %s465_s29, %s465_s29, %s466_s30  }
 0x11e PF: > { %p356_p13 = scmp.ge.s32.totalorder %s459_s12, 2  ;;  %s276_s3 = sand.u32 1, %s447_s9  }
 0x11f   : > { %s277_s4 = scalar_lea.sflag [#allocation3], %s276_s3 }
 0x120   : > { %p353_p0 = pnand %p356_p13, %p524_p6 }
 0x122   : > { %p354_p1 = pneg %p353_p0 }
 0x124   : > { %442 = dma.done.wait (%p354_p1), %s277_s4, 512  }
 0x125   : > { %444 = vsyncadd (%p354_p1), %s277_s4, 4294966784  ;;  %p12_p2 = scmp.ge.s32.totalorder %s507_s15, 4   ;;  %s599_s9 = smov %s451_s10 }
 0x126   : > { %s600_s10 = smov %s455_s11  ;;  %s601_s11 = smov %s518_s18 }
 0x127   : > { %s602_s12 = smov %s507_s15  ;;  %14 = sbr.rel (!%p12_p2) target bundleno = 3 (0x3), region = 66 }
 0x12c   :  { %282 = vsyncpa [#allocation3], 1 }
 0x12d   :  { %284 = vsyncpa [#allocation3 + $0x1], 1 }

</bundles_post_ra>
